<compile_context>
chip_gen: v7x
topology: tpu7x:2x2x1
jax: 0.10.0
libtpu: 0.0.40
codegen_flags: <defaults>
</compile_context>

<pallas_src>
import math

import jax
import jax.numpy as jnp
from jax.experimental import pallas as pl
from jax.experimental.pallas import tpu as pltpu


def _lnreg_kernel(wb_ref, x1_ref, x2_ref, o_ref):
    # wb_ref: SMEM [3] = (w0, w1, b)
    # x1_ref / x2_ref / o_ref: VMEM [block_rows, LANE] lane-dense tiles
    w0 = wb_ref[0]
    w1 = wb_ref[1]
    b = wb_ref[2]
    # Pure per-lane VPU fma; scalar * vector broadcasts from SMEM scalars.
    o_ref[...] = x1_ref[...] * w0 + x2_ref[...] * w1 + b


def lnreg_forward(x1, x2, weight, bias, *, lane=512, max_block_rows=256):
    """Equivalent of lnreg.forward: Linear(2,1) applied to features (x1, x2).

    x1, x2: [N, 1] (or [N]) float32
    weight: [1, 2] float32   (PyTorch Linear weight layout [out, in])
    bias:   [1]   float32
    returns y_pred: [N, 1] float32
    """
    x1f = x1.reshape(-1).astype(jnp.float32)
    x2f = x2.reshape(-1).astype(jnp.float32)
    n = x1f.shape[0]

    # Lane-dense slab layout: batch flattened onto (sublane, lane).
    cols = lane                                  # multiple of 128
    rows = -(-n // cols)                         # ceil
    rows8 = ((rows + 7) // 8) * 8                # multiple of 8 sublanes
    block_rows = min(max_block_rows, rows8)      # multiple of 8, capped
    padded_rows = -(-rows8 // block_rows) * block_rows
    pad = padded_rows * cols - n

    x1p = jnp.pad(x1f, (0, pad)).reshape(padded_rows, cols)
    x2p = jnp.pad(x2f, (0, pad)).reshape(padded_rows, cols)

    # Scalar params -> SMEM: (w0, w1, b)
    wb = jnp.stack(
        [weight[0, 0], weight[0, 1], bias[0]]
    ).astype(jnp.float32)                        # [3]

    grid = (padded_rows // block_rows,)

    out = pl.pallas_call(
        _lnreg_kernel,
        out_shape=jax.ShapeDtypeStruct((padded_rows, cols), jnp.float32),
        grid=grid,
        in_specs=[
            pl.BlockSpec(memory_space=pltpu.MemorySpace.SMEM),           # wb [3]
            pl.BlockSpec((block_rows, cols), lambda i: (i, 0)),          # x1 tile
            pl.BlockSpec((block_rows, cols), lambda i: (i, 0)),          # x2 tile
        ],
        out_specs=pl.BlockSpec((block_rows, cols), lambda i: (i, 0)),
        compiler_params=pltpu.CompilerParams(
            dimension_semantics=("parallel",),   # v7x: 2 TCs split the batch grid
        ),
    )(wb, x1p, x2p)

    # Un-pad / restore [N, 1] output layout (wrapper-side layout plumbing only).
    return out.reshape(-1)[:n].reshape(n, 1)


def init_lnreg_params(key):
    """Deterministic init matching torch.nn.Linear(2, 1) default:
    weight, bias ~ U(-1/sqrt(in_features), 1/sqrt(in_features))."""
    kw, kb = jax.random.split(key)
    bound = 1.0 / math.sqrt(2.0)
    weight = jax.random.uniform(kw, (1, 2), jnp.float32, -bound, bound)
    bias = jax.random.uniform(kb, (1,), jnp.float32, -bound, bound)
    return weight, bias


if __name__ == "__main__":
    key = jax.random.PRNGKey(0)
    k_param, k_x1, k_x2 = jax.random.split(key, 3)

    weight, bias = init_lnreg_params(k_param)

    # Small deterministic inputs: batch of 8 samples, one scalar feature per
    # input (matching the "hours" tensors of the original module).
    N = 8
    x1 = jax.random.uniform(k_x1, (N, 1), jnp.float32, 0.0, 10.0)
    x2 = jax.random.uniform(k_x2, (N, 1), jnp.float32, 0.0, 10.0)

    fwd = jax.jit(lnreg_forward)
    y_pred = fwd(x1, x2, weight, bias)
    jax.block_until_ready(y_pred)

    # Reference check in plain JAX (same math as torch Linear(2, 1)).
    ref = jnp.concatenate([x1, x2], axis=-1) @ weight.T + bias
    assert y_pred.shape == (N, 1)
    assert jnp.allclose(y_pred, ref, atol=1e-5), "mismatch vs reference"

    print("KERNEL_OK")
</pallas_src>

<mosaic_0001>
module attributes {stable_mosaic.version = 11 : i64} {
  func.func @_lnreg_kernel(%arg0: i32, %arg1: memref<3xf32, #tpu.memory_space<smem>>, %arg2: memref<8x512xf32, #tpu.memory_space<vmem>>, %arg3: memref<8x512xf32, #tpu.memory_space<vmem>>, %arg4: memref<8x512xf32, #tpu.memory_space<vmem>>) attributes {dimension_semantics = [#tpu.dimension_semantics<parallel>], iteration_bounds = array<i64: 1>, scalar_prefetch = 0 : i64, scratch_operands = 0 : i64, tpu.core_type = #tpu.core_type<tc>, window_params = [{transform_indices = @transform_0, window_bounds = array<i64: 3>}, {transform_indices = @transform_1, window_bounds = array<i64: 8, 512>}, {transform_indices = @transform_2, window_bounds = array<i64: 8, 512>}, {transform_indices = @transform_3, window_bounds = array<i64: 8, 512>}]} {
    %c0 = arith.constant 0 : index
    %0 = memref.load %arg1[%c0] : memref<3xf32, #tpu.memory_space<smem>>
    %c1 = arith.constant 1 : index
    %1 = memref.load %arg1[%c1] : memref<3xf32, #tpu.memory_space<smem>>
    %c2 = arith.constant 2 : index
    %2 = memref.load %arg1[%c2] : memref<3xf32, #tpu.memory_space<smem>>
    %c0_0 = arith.constant 0 : index
    %c0_1 = arith.constant 0 : index
    %3 = vector.load %arg2[%c0_0, %c0_1] : memref<8x512xf32, #tpu.memory_space<vmem>>, vector<8x512xf32>
    %4 = vector.broadcast %0 : f32 to vector<8x512xf32>
    %5 = arith.mulf %3, %4 : vector<8x512xf32>
    %c0_2 = arith.constant 0 : index
    %c0_3 = arith.constant 0 : index
    %6 = vector.load %arg3[%c0_2, %c0_3] : memref<8x512xf32, #tpu.memory_space<vmem>>, vector<8x512xf32>
    %7 = vector.broadcast %1 : f32 to vector<8x512xf32>
    %8 = arith.mulf %6, %7 : vector<8x512xf32>
    %9 = arith.addf %5, %8 : vector<8x512xf32>
    %10 = vector.broadcast %2 : f32 to vector<8x512xf32>
    %11 = arith.addf %9, %10 : vector<8x512xf32>
    %c0_4 = arith.constant 0 : index
    %c0_5 = arith.constant 0 : index
    %12 = vector.load %arg4[%c0_4, %c0_5] : memref<8x512xf32, #tpu.memory_space<vmem>>, vector<8x512xf32>
    tpu.vector_store %arg4[%c0_4, %c0_5], %11 {strides = array<i32>} : memref<8x512xf32, #tpu.memory_space<vmem>>, vector<8x512xf32>,
    return
  }
  func.func @transform_0(%arg0: i32) -> i32 {
    %c0_i32 = arith.constant 0 : i32
    %c0_i32_0 = arith.constant 0 : i32
    return %c0_i32 : i32
  }
  func.func @transform_1(%arg0: i32) -> (i32, i32) {
    %c0_i32 = arith.constant 0 : i32
    %c0_i32_0 = arith.constant 0 : i32
    return %arg0, %c0_i32 : i32, i32
  }
  func.func @transform_2(%arg0: i32) -> (i32, i32) {
    %c0_i32 = arith.constant 0 : i32
    %c0_i32_0 = arith.constant 0 : i32
    return %arg0, %c0_i32 : i32, i32
  }
  func.func @transform_3(%arg0: i32) -> (i32, i32) {
    %c0_i32 = arith.constant 0 : i32
    %c0_i32_0 = arith.constant 0 : i32
    return %arg0, %c0_i32 : i32, i32
  }
}

</mosaic_0001>

<bundles_post_ra>
// kernel: lnreg_forward.1
= control target key start
LH: loop header
LB: loop body
LE: loop exit
PB: predicated region body
PF: predicated region fallthrough
CT: control target
= control target key end

     0   :  { %8 = vsyncpa [#allocation3], 0  ;;  %s143_s0 = inlined_call_operand.vmem [shape: f32[3], index: 0, kind: input, shape index: {}]   ;;  %s144_s1 = inlined_call_operand.vmem [shape: f32[8,512], index: 1, kind: input, shape index: {}]   ;;  %s145_s2 = inlined_call_operand.vmem [shape: f32[8,512], index: 2, kind: input, shape index: {}]   ;;  %s146_s3 = inlined_call_operand.vmem [shape: f32[8,512], index: 3, kind: output, shape index: {}]  }
   0x1   :  { %s15_s14 = sshll.u32 %s143_s0, 4  ;;  %s16_s14 = int_to_ptr.vmem [resolvable:$true] %s15_s14 }
   0x2   :  { %s69_s15 = scalar_lea.vmem %s16_s14, 16  ;;  %p74_p1 = scmp.lt.s32.totalorder %s16_s14, %s16_s14 }
   0x3   :  { %p70_p0 = scmp.ne.s32.totalorder %s16_s14, %s69_s15  ;;  %p75_p2 = scmp.lt.s32.totalorder %s69_s15, %s69_s15 }
   0x5   :  { %p76_p3 = por %p75_p2, %p74_p1 }
   0x7   :  { %p77_p4 = pnand %p76_p3, %p70_p0 }
   0x9   :  { %80 = shalt.err (!%p77_p4)
}
   0xa   :  { %s83_s16 = smov [#allocation2]  }
   0xb   :  { %18 = dma.vmem_to_smem %s16_s14, 16, %s83_s16, [#allocation3]  }
   0xc   :  { %81 = dma.done.wait [#allocation3], 16  }
   0xd   :  { %82 = vsyncadd [#allocation3], 4294967280 }
   0xe   :  { %26 = sfence }
   0xf   :  { %s27_s17 = sld [smem:[#allocation2]]  ;;  %s66_s18 = sld [smem:[#allocation2 + $0x1]]  ;;  %v30_v0 = vld [vmem:[%s144_s1] sm:$0xff]  ;;  %v31_v2 = vld [vmem:[%s144_s1 + $0x8] sm:$0xff]  ;;  %v32_v4 = vld [vmem:[%s144_s1 + $0x10] sm:$0xff] }
  0x10   :  { %s67_s19 = sld [smem:[#allocation2 + $0x2]]  ;;  %v39_v1 = vld [vmem:[%s145_s2] sm:$0xff]  ;;  %v40_v3 = vld [vmem:[%s145_s2 + $0x8] sm:$0xff]  ;;  %v41_v5 = vld [vmem:[%s145_s2 + $0x10] sm:$0xff] }
  0x11   :  { %v33_v6 = vld [vmem:[%s144_s1 + $0x18] sm:$0xff] }
  0x12   :  { %v42_v9 = vld [vmem:[%s145_s2 + $0x18] sm:$0xff] }
  0x15   :  { %v34_v7 = vstv %s27_s17  ;;  %v43_v8 = vstv %s66_s18 }
  0x16   :  { %v35_v10 = vmul.f32 %v34_v7, %v30_v0  ;;  %v44_v11 = vmul.f32 %v43_v8, %v39_v1  ;;  %v52_v12 = vstv %s67_s19  ;;  %v36_v13 = vmul.f32 %v34_v7, %v31_v2 }
  0x17   :  { %v45_v14 = vmul.f32 %v43_v8, %v40_v3  ;;  %v37_v15 = vmul.f32 %v34_v7, %v32_v4  ;;  %v46_v16 = vmul.f32 %v43_v8, %v41_v5  ;;  %v38_v17 = vmul.f32 %v34_v7, %v33_v6 }
  0x18   :  { %v48_v18 = vadd.f32 %v44_v11, %v35_v10  ;;  %v47_v19 = vmul.f32 %v43_v8, %v42_v9 }
  0x19   :  { %v49_v20 = vadd.f32 %v45_v14, %v36_v13  ;;  %v50_v21 = vadd.f32 %v46_v16, %v37_v15 }
  0x1a   :  { %v53_v22 = vadd.f32 %v52_v12, %v48_v18  ;;  %v51_v23 = vadd.f32 %v47_v19, %v38_v17 }
  0x1b   :  { %v54_v24 = vadd.f32 %v52_v12, %v49_v20  ;;  %v55_v25 = vadd.f32 %v52_v12, %v50_v21 }
  0x1c   :  { %57 = vst [vmem:[%s146_s3] sm:$0xff] %v53_v22  ;;  %v56_v26 = vadd.f32 %v52_v12, %v51_v23 }
  0x1d   :  { %58 = vst [vmem:[%s146_s3 + $0x8] sm:$0xff] %v54_v24  ;;  %59 = vst [vmem:[%s146_s3 + $0x10] sm:$0xff] %v55_v25 }
  0x1e   :  { %60 = vst [vmem:[%s146_s3 + $0x18] sm:$0xff] %v56_v26 }
  0x1f   :  { %65 = vsyncpa [#allocation3], 1 }

</bundles_post_ra>
